<compile_context>
chip_gen: v7x
topology: tpu7x:2x2x1
jax: 0.10.0
libtpu: 0.0.40
codegen_flags: <defaults>
</compile_context>

<pallas_src>
import functools
import math

import jax
import jax.numpy as jnp
from jax.experimental import pallas as pl
from jax.experimental.pallas import tpu as pltpu

LANES = 128
SUBLANES = 8
TILE = SUBLANES * LANES  # 1024 elements per (8,128) f32 tile = 4 KiB


def _max_block_tiles():
    """Per-generation block size in (8,128) tiles (4 KiB/tile/input for f32).

    In-flight VMEM ~= 2 inputs x 2 buffers x block bytes, so:
      1024 tiles -> 16 MiB in flight (fits v6e/v7x 32 MiB default scoped VMEM)
       512 tiles ->  8 MiB in flight (fits v5e 16 MiB default scoped VMEM)
    device_kind is used instead of get_tpu_info() because it is stable across
    JAX versions; unknown chips fall back to the conservative size.
    """
    try:
        kind = jax.devices()[0].device_kind.lower()
    except Exception:  # pragma: no cover - defensive only
        kind = ""
    if "v6" in kind or "v7" in kind:
        return 1024
    return 512


def _iou_partial_kernel(x_ref, t_ref, sx_ref, st_ref, stp_ref, *,
                        t_logit, threshold, block_tiles, total_tiles,
                        steps_per_core, needs_mask):
    """Accumulate per-core (8,128) partial sums of x_bin, t_bin, x_bin*t_bin.

    Grid = (2 cores [parallel], steps_per_core [arbitrary]); x_ref/t_ref are
    (block_tiles, 8, 128) blocks; sx/st/stp are (1, 8, 128) resident output
    accumulators (one row per core in the (2, 8, 128) output arrays).
    """
    c = pl.program_id(0)   # core split (parallel axis)
    i = pl.program_id(1)   # streaming step within this core (reduction axis)

    @pl.when(i == 0)
    def _():
        sx_ref[...] = jnp.zeros_like(sx_ref)
        st_ref[...] = jnp.zeros_like(st_ref)
        stp_ref[...] = jnp.zeros_like(stp_ref)

    def accumulate(limit=None):
        # sigmoid(x) > thr  <=>  x > logit(thr)  (sigmoid removed; EUP not needed).
        pred = x_ref[...] > t_logit
        truth = t_ref[...] > threshold
        if limit is not None:
            # Only emitted for boundary/overshoot steps (gated below by pl.when):
            # mask whole invalid (8,128) tiles of this block.
            tile_ids = jax.lax.broadcasted_iota(jnp.int32, x_ref.shape, 0)
            valid = tile_ids < limit
            pred = jnp.logical_and(pred, valid)
            truth = jnp.logical_and(truth, valid)
        xb = jnp.where(pred, 1.0, 0.0)
        tb = jnp.where(truth, 1.0, 0.0)
        # Leading-axis reductions only: pure VALU vreg adds into full (8,128)
        # accumulators; no XLU collapse or masked sub-vreg store in the loop.
        sx_ref[...] += jnp.sum(xb, axis=0, keepdims=True)
        st_ref[...] += jnp.sum(tb, axis=0, keepdims=True)
        stp_ref[...] += jnp.sum(xb * tb, axis=0, keepdims=True)

    if not needs_mask:
        # Every block of every step is fully valid: single unmasked hot path.
        accumulate()
    else:
        # Scalar-only bookkeeping per step (free): how many tiles of the block
        # assigned to this (core, step) are real.
        assigned = c * steps_per_core + i
        n_valid = jnp.clip(total_tiles - assigned * block_tiles, 0, block_tiles)

        @pl.when(n_valid == block_tiles)
        def _():
            accumulate()                  # hot path: no masking work at all

        @pl.when(n_valid < block_tiles)
        def _():
            accumulate(limit=n_valid)     # boundary / overshoot step only


def iou_loss(inputs, targets, threshold, *, max_block_tiles=None):
    """Pallas TPU implementation of IoULoss.forward (no-grad metric)."""
    assert inputs.shape == targets.shape
    thr = float(threshold)
    if thr <= 0.0:
        t_logit = float("-inf")
    elif thr >= 1.0:
        t_logit = float("inf")
    else:
        t_logit = math.log(thr / (1.0 - thr))

    x = jnp.ravel(inputs)     # native dtype kept; no wrapper astype pass
    t = jnp.ravel(targets)
    n = x.shape[0]

    num_tiles = n // TILE
    tail = n - num_tiles * TILE

    if num_tiles == 0:
        # Tiny input (< 1024 elems): pad to a single tile with -inf, which can
        # never satisfy either compare, so the pad contributes nothing.
        pad = TILE - n
        x_main = jnp.pad(x.astype(jnp.float32), (0, pad), constant_values=-jnp.inf)
        t_main = jnp.pad(t.astype(jnp.float32), (0, pad), constant_values=-jnp.inf)
        num_tiles, tail = 1, 0
    elif tail:
        # Ragged tail (< 1024 elems) is folded in below with plain JAX; the
        # kernel streams the tile-aligned prefix (no full-array pad copy).
        x_main = jax.lax.slice(x, (0,), (num_tiles * TILE,))
        t_main = jax.lax.slice(t, (0,), (num_tiles * TILE,))
    else:
        x_main, t_main = x, t

    x3 = x_main.reshape(num_tiles, SUBLANES, LANES)   # free row-major reshape
    t3 = t_main.reshape(num_tiles, SUBLANES, LANES)

    # Block / grid geometry: split blocks evenly across the 2-way parallel axis.
    max_tiles = int(max_block_tiles) if max_block_tiles is not None else _max_block_tiles()
    block_tiles = max(1, min(max_tiles, -(-num_tiles // 2)))
    num_blocks = -(-num_tiles // block_tiles)
    steps_per_core = -(-num_blocks // 2)
    # Masking needed only if the last real block is partial, or the even split
    # gives one core an overshoot step (odd num_blocks).
    needs_mask = (num_tiles % block_tiles != 0) or (2 * steps_per_core != num_blocks)

    def in_index_map(c, i):
        # Clamp overshoot steps onto the last real block (their contribution is
        # masked to zero in-kernel); keeps every DMA in bounds.
        b = jnp.minimum(c * steps_per_core + i, num_blocks - 1)
        return (b, 0, 0)

    kernel = functools.partial(
        _iou_partial_kernel,
        t_logit=t_logit,
        threshold=thr,
        block_tiles=int(block_tiles),
        total_tiles=int(num_tiles),
        steps_per_core=int(steps_per_core),
        needs_mask=bool(needs_mask),
    )

    part_shape = jax.ShapeDtypeStruct((2, SUBLANES, LANES), jnp.float32)
    # Default double-buffering is kept; TODO(synk): sweep pl.Buffered(3) on the
    # in_specs if a v7x profile shows exposed DMA at step boundaries.
    sx, st, stp = pl.pallas_call(
        kernel,
        out_shape=(part_shape, part_shape, part_shape),
        grid_spec=pltpu.PrefetchScalarGridSpec(
            num_scalar_prefetch=0,
            grid=(2, steps_per_core),
            in_specs=[
                pl.BlockSpec((block_tiles, SUBLANES, LANES), in_index_map),
                pl.BlockSpec((block_tiles, SUBLANES, LANES), in_index_map),
            ],
            out_specs=[
                pl.BlockSpec((1, SUBLANES, LANES), lambda c, i: (c, 0, 0)),
                pl.BlockSpec((1, SUBLANES, LANES), lambda c, i: (c, 0, 0)),
                pl.BlockSpec((1, SUBLANES, LANES), lambda c, i: (c, 0, 0)),
            ],
        ),
        compiler_params=pltpu.CompilerParams(
            dimension_semantics=("parallel", "arbitrary"),
        ),
    )(x3, t3)

    # Combine per-core partial sums (never per-core ratios), add the ragged
    # tail (handled in plain JAX on < 1024 elements), then divide once.
    sum_x = jnp.sum(sx)
    sum_t = jnp.sum(st)
    tp = jnp.sum(stp)

    if tail:
        xt = x[num_tiles * TILE:]
        tt = t[num_tiles * TILE:]
        xb_t = jnp.where(xt > t_logit, 1.0, 0.0)
        tb_t = jnp.where(tt > thr, 1.0, 0.0)
        sum_x = sum_x + jnp.sum(xb_t)
        sum_t = sum_t + jnp.sum(tb_t)
        tp = tp + jnp.sum(xb_t * tb_t)

    union = sum_x + sum_t - tp          # TP + FN + FP
    return tp / (union + 1e-9)


def iou_loss_ref(inputs, targets, threshold):
    """Pure-JAX reference matching the PyTorch forward."""
    x = jax.nn.sigmoid(inputs.astype(jnp.float32))
    xb = jnp.where(x > threshold, 1.0, 0.0).ravel()
    tb = jnp.where(targets.astype(jnp.float32) > threshold, 1.0, 0.0).ravel()
    tp = jnp.sum(xb * tb)
    fn = jnp.sum((1.0 - xb) * tb)
    fp = jnp.sum(xb * (1.0 - tb))
    return tp / (tp + fn + fp + 1e-9)


if __name__ == "__main__":
    key = jax.random.PRNGKey(0)
    ks = jax.random.split(key, 10)
    threshold = 0.5

    # 1) Small segmentation-like logits/targets (NCHW), tile-aligned (zero-copy path).
    inputs = jax.random.normal(ks[0], (2, 4, 16, 16), dtype=jnp.float32)
    targets = (jax.random.uniform(ks[1], (2, 4, 16, 16)) > 0.5).astype(jnp.float32)
    out = jax.block_until_ready(iou_loss(inputs, targets, threshold))
    ref = iou_loss_ref(inputs, targets, threshold)
    assert jnp.allclose(out, ref, atol=1e-6, rtol=1e-6), (out, ref)

    # 2) Ragged shape: exercises the plain-JAX tail + overshoot-step masking.
    xr = jax.random.normal(ks[2], (3, 5, 7, 11), dtype=jnp.float32)
    tr = (jax.random.uniform(ks[3], (3, 5, 7, 11)) > 0.5).astype(jnp.float32)
    out_r = jax.block_until_ready(iou_loss(xr, tr, threshold))
    ref_r = iou_loss_ref(xr, tr, threshold)
    assert jnp.allclose(out_r, ref_r, atol=1e-6, rtol=1e-6), (out_r, ref_r)

    # 3) Larger case: both "cores" of the parallel axis get a full block each.
    xm = jax.random.normal(ks[4], (2, 5, 256, 256), dtype=jnp.float32)
    tm = (jax.random.uniform(ks[5], (2, 5, 256, 256)) > 0.5).astype(jnp.float32)
    out_m = jax.block_until_ready(iou_loss(xm, tm, threshold))
    ref_m = iou_loss_ref(xm, tm, threshold)
    assert jnp.allclose(out_m, ref_m, atol=1e-6, rtol=1e-6), (out_m, ref_m)

    # 4) Forced-small blocks: multi-step accumulation + partial + overshoot steps.
    xs = jax.random.normal(ks[6], (2, 4, 64, 64), dtype=jnp.float32)
    ts = (jax.random.uniform(ks[7], (2, 4, 64, 64)) > 0.5).astype(jnp.float32)
    out_s = jax.block_until_ready(iou_loss(xs, ts, threshold, max_block_tiles=5))
    ref_s = iou_loss_ref(xs, ts, threshold)
    assert jnp.allclose(out_s, ref_s, atol=1e-6, rtol=1e-6), (out_s, ref_s)

    # 5) Non-default threshold (checks the logit-threshold trick).
    out_t = jax.block_until_ready(iou_loss(inputs, targets, 0.3))
    ref_t = iou_loss_ref(inputs, targets, 0.3)
    assert jnp.allclose(out_t, ref_t, atol=1e-6, rtol=1e-6), (out_t, ref_t)

    # 6) Tiny input (< one (8,128) tile): exercises the -inf one-tile fallback.
    xt = jax.random.normal(ks[8], (4, 7), dtype=jnp.float32)
    tt = (jax.random.uniform(ks[9], (4, 7)) > 0.5).astype(jnp.float32)
    out_tiny = jax.block_until_ready(iou_loss(xt, tt, threshold))
    ref_tiny = iou_loss_ref(xt, tt, threshold)
    assert jnp.allclose(out_tiny, ref_tiny, atol=1e-6, rtol=1e-6), (out_tiny, ref_tiny)

    print("KERNEL_OK")
</pallas_src>

<mosaic_0001>
module attributes {stable_mosaic.version = 11 : i64} {
  func.func @_iou_partial_kernel(%arg0: i32, %arg1: i32, %arg2: memref<1x8x128xf32, #tpu.memory_space<vmem>>, %arg3: memref<1x8x128xf32, #tpu.memory_space<vmem>>, %arg4: memref<1x8x128xf32, #tpu.memory_space<vmem>>, %arg5: memref<1x8x128xf32, #tpu.memory_space<vmem>>, %arg6: memref<1x8x128xf32, #tpu.memory_space<vmem>>) attributes {dimension_semantics = [#tpu.dimension_semantics<parallel>, #tpu.dimension_semantics<arbitrary>], iteration_bounds = array<i64: 2, 1>, scalar_prefetch = 0 : i64, scratch_operands = 0 : i64, tpu.core_type = #tpu.core_type<tc>, window_params = [{transform_indices = @transform_0, window_bounds = array<i64: 1, 8, 128>}, {transform_indices = @transform_1, window_bounds = array<i64: 1, 8, 128>}, {transform_indices = @transform_2, window_bounds = array<i64: 1, 8, 128>}, {transform_indices = @transform_3, window_bounds = array<i64: 1, 8, 128>}, {transform_indices = @transform_4, window_bounds = array<i64: 1, 8, 128>}]} {
    %c0_i32 = arith.constant 0 : i32
    %0 = arith.cmpi eq, %arg1, %c0_i32 : i32
    %1 = arith.extui %0 : i1 to i32
    %c0_i32_0 = arith.constant 0 : i32
    %2 = arith.cmpi ne, %1, %c0_i32_0 : i32
    scf.if %2 {
      %cst_32 = arith.constant 0.000000e+00 : f32
      %31 = vector.broadcast %cst_32 : f32 to vector<1x8x128xf32>
      %c0_33 = arith.constant 0 : index
      %c0_34 = arith.constant 0 : index
      %c0_35 = arith.constant 0 : index
      %32 = vector.load %arg4[%c0_33, %c0_34, %c0_35] : memref<1x8x128xf32, #tpu.memory_space<vmem>>, vector<1x8x128xf32>
      tpu.vector_store %arg4[%c0_33, %c0_34, %c0_35], %31 {strides = array<i32>} : memref<1x8x128xf32, #tpu.memory_space<vmem>>, vector<1x8x128xf32>,
      %cst_36 = arith.constant 0.000000e+00 : f32
      %33 = vector.broadcast %cst_36 : f32 to vector<1x8x128xf32>
      %c0_37 = arith.constant 0 : index
      %c0_38 = arith.constant 0 : index
      %c0_39 = arith.constant 0 : index
      %34 = vector.load %arg5[%c0_37, %c0_38, %c0_39] : memref<1x8x128xf32, #tpu.memory_space<vmem>>, vector<1x8x128xf32>
      tpu.vector_store %arg5[%c0_37, %c0_38, %c0_39], %33 {strides = array<i32>} : memref<1x8x128xf32, #tpu.memory_space<vmem>>, vector<1x8x128xf32>,
      %cst_40 = arith.constant 0.000000e+00 : f32
      %35 = vector.broadcast %cst_40 : f32 to vector<1x8x128xf32>
      %c0_41 = arith.constant 0 : index
      %c0_42 = arith.constant 0 : index
      %c0_43 = arith.constant 0 : index
      %36 = vector.load %arg6[%c0_41, %c0_42, %c0_43] : memref<1x8x128xf32, #tpu.memory_space<vmem>>, vector<1x8x128xf32>
      tpu.vector_store %arg6[%c0_41, %c0_42, %c0_43], %35 {strides = array<i32>} : memref<1x8x128xf32, #tpu.memory_space<vmem>>, vector<1x8x128xf32>,
    } else {
    }
    %c0 = arith.constant 0 : index
    %c0_1 = arith.constant 0 : index
    %c0_2 = arith.constant 0 : index
    %3 = vector.load %arg2[%c0, %c0_1, %c0_2] : memref<1x8x128xf32, #tpu.memory_space<vmem>>, vector<1x8x128xf32>
    %cst = arith.constant 0.000000e+00 : f32
    %4 = vector.broadcast %cst : f32 to vector<1x8x128xf32>
    %5 = arith.cmpf ogt, %3, %4 : vector<1x8x128xf32>
    %c0_3 = arith.constant 0 : index
    %c0_4 = arith.constant 0 : index
    %c0_5 = arith.constant 0 : index
    %6 = vector.load %arg3[%c0_3, %c0_4, %c0_5] : memref<1x8x128xf32, #tpu.memory_space<vmem>>, vector<1x8x128xf32>
    %cst_6 = arith.constant 5.000000e-01 : f32
    %7 = vector.broadcast %cst_6 : f32 to vector<1x8x128xf32>
    %8 = arith.cmpf ogt, %6, %7 : vector<1x8x128xf32>
    %cst_7 = arith.constant 1.000000e+00 : f32
    %cst_8 = arith.constant 0.000000e+00 : f32
    %9 = vector.broadcast %cst_7 : f32 to vector<1x8x128xf32>
    %10 = vector.broadcast %cst_8 : f32 to vector<1x8x128xf32>
    %11 = arith.select %5, %9, %10 : vector<1x8x128xi1>, vector<1x8x128xf32>
    %cst_9 = arith.constant 1.000000e+00 : f32
    %cst_10 = arith.constant 0.000000e+00 : f32
    %12 = vector.broadcast %cst_9 : f32 to vector<1x8x128xf32>
    %13 = vector.broadcast %cst_10 : f32 to vector<1x8x128xf32>
    %14 = arith.select %8, %12, %13 : vector<1x8x128xi1>, vector<1x8x128xf32>
    %c0_11 = arith.constant 0 : index
    %c0_12 = arith.constant 0 : index
    %c0_13 = arith.constant 0 : index
    %15 = vector.load %arg4[%c0_11, %c0_12, %c0_13] : memref<1x8x128xf32, #tpu.memory_space<vmem>>, vector<1x8x128xf32>
    %cst_14 = arith.constant dense<0.000000e+00> : vector<8x128xf32>
    %16 = vector.multi_reduction <add>, %11, %cst_14 [0] : vector<1x8x128xf32> to vector<8x128xf32>
    %17 = vector.shape_cast %16 : vector<8x128xf32> to vector<1x8x128xf32>
    %18 = arith.addf %15, %17 : vector<1x8x128xf32>
    %c0_15 = arith.constant 0 : index
    %c0_16 = arith.constant 0 : index
    %c0_17 = arith.constant 0 : index
    %19 = vector.load %arg4[%c0_15, %c0_16, %c0_17] : memref<1x8x128xf32, #tpu.memory_space<vmem>>, vector<1x8x128xf32>
    tpu.vector_store %arg4[%c0_15, %c0_16, %c0_17], %18 {strides = array<i32>} : memref<1x8x128xf32, #tpu.memory_space<vmem>>, vector<1x8x128xf32>,
    %c0_18 = arith.constant 0 : index
    %c0_19 = arith.constant 0 : index
    %c0_20 = arith.constant 0 : index
    %20 = vector.load %arg5[%c0_18, %c0_19, %c0_20] : memref<1x8x128xf32, #tpu.memory_space<vmem>>, vector<1x8x128xf32>
    %cst_21 = arith.constant dense<0.000000e+00> : vector<8x128xf32>
    %21 = vector.multi_reduction <add>, %14, %cst_21 [0] : vector<1x8x128xf32> to vector<8x128xf32>
    %22 = vector.shape_cast %21 : vector<8x128xf32> to vector<1x8x128xf32>
    %23 = arith.addf %20, %22 : vector<1x8x128xf32>
    %c0_22 = arith.constant 0 : index
    %c0_23 = arith.constant 0 : index
    %c0_24 = arith.constant 0 : index
    %24 = vector.load %arg5[%c0_22, %c0_23, %c0_24] : memref<1x8x128xf32, #tpu.memory_space<vmem>>, vector<1x8x128xf32>
    tpu.vector_store %arg5[%c0_22, %c0_23, %c0_24], %23 {strides = array<i32>} : memref<1x8x128xf32, #tpu.memory_space<vmem>>, vector<1x8x128xf32>,
    %c0_25 = arith.constant 0 : index
    %c0_26 = arith.constant 0 : index
    %c0_27 = arith.constant 0 : index
    %25 = vector.load %arg6[%c0_25, %c0_26, %c0_27] : memref<1x8x128xf32, #tpu.memory_space<vmem>>, vector<1x8x128xf32>
    %26 = arith.mulf %11, %14 : vector<1x8x128xf32>
    %cst_28 = arith.constant dense<0.000000e+00> : vector<8x128xf32>
    %27 = vector.multi_reduction <add>, %26, %cst_28 [0] : vector<1x8x128xf32> to vector<8x128xf32>
    %28 = vector.shape_cast %27 : vector<8x128xf32> to vector<1x8x128xf32>
    %29 = arith.addf %25, %28 : vector<1x8x128xf32>
    %c0_29 = arith.constant 0 : index
    %c0_30 = arith.constant 0 : index
    %c0_31 = arith.constant 0 : index
    %30 = vector.load %arg6[%c0_29, %c0_30, %c0_31] : memref<1x8x128xf32, #tpu.memory_space<vmem>>, vector<1x8x128xf32>
    tpu.vector_store %arg6[%c0_29, %c0_30, %c0_31], %29 {strides = array<i32>} : memref<1x8x128xf32, #tpu.memory_space<vmem>>, vector<1x8x128xf32>,
    return
  }
  func.func @transform_0(%arg0: i32, %arg1: i32) -> (i32, i32, i32) {
    %c1_i32 = arith.constant 1 : i32
    %0 = arith.muli %arg0, %c1_i32 : i32
    %1 = arith.addi %0, %arg1 : i32
    %c1_i32_0 = arith.constant 1 : i32
    %2 = arith.minsi %1, %c1_i32_0 : i32
    %c0_i32 = arith.constant 0 : i32
    %c0_i32_1 = arith.constant 0 : i32
    %c0_i32_2 = arith.constant 0 : i32
    return %2, %c0_i32, %c0_i32_1 : i32, i32, i32
  }
  func.func @transform_1(%arg0: i32, %arg1: i32) -> (i32, i32, i32) {
    %c1_i32 = arith.constant 1 : i32
    %0 = arith.muli %arg0, %c1_i32 : i32
    %1 = arith.addi %0, %arg1 : i32
    %c1_i32_0 = arith.constant 1 : i32
    %2 = arith.minsi %1, %c1_i32_0 : i32
    %c0_i32 = arith.constant 0 : i32
    %c0_i32_1 = arith.constant 0 : i32
    %c0_i32_2 = arith.constant 0 : i32
    return %2, %c0_i32, %c0_i32_1 : i32, i32, i32
  }
  func.func @transform_2(%arg0: i32, %arg1: i32) -> (i32, i32, i32) {
    %c0_i32 = arith.constant 0 : i32
    %c0_i32_0 = arith.constant 0 : i32
    %c0_i32_1 = arith.constant 0 : i32
    return %arg0, %c0_i32, %c0_i32_0 : i32, i32, i32
  }
  func.func @transform_3(%arg0: i32, %arg1: i32) -> (i32, i32, i32) {
    %c0_i32 = arith.constant 0 : i32
    %c0_i32_0 = arith.constant 0 : i32
    %c0_i32_1 = arith.constant 0 : i32
    return %arg0, %c0_i32, %c0_i32_0 : i32, i32, i32
  }
  func.func @transform_4(%arg0: i32, %arg1: i32) -> (i32, i32, i32) {
    %c0_i32 = arith.constant 0 : i32
    %c0_i32_0 = arith.constant 0 : i32
    %c0_i32_1 = arith.constant 0 : i32
    return %arg0, %c0_i32, %c0_i32_0 : i32, i32, i32
  }
}

</mosaic_0001>

<bundles_post_ra>
// kernel: tpu_custom_call.1
= control target key start
LH: loop header
LB: loop body
LE: loop exit
PB: predicated region body
PF: predicated region fallthrough
CT: control target
= control target key end

     0   :  { %s1262_s0 = inlined_call_operand.hbm [shape: f32[2,8,128], index: 0, kind: input, shape index: {}]   ;;  %s1263_s1 = inlined_call_operand.hbm [shape: f32[2,8,128], index: 1, kind: input, shape index: {}]   ;;  %s1264_s2 = inlined_call_operand.hbm [shape: f32[2,8,128], index: 2, kind: output, shape index: {0}]   ;;  %s1265_s3 = inlined_call_operand.hbm [shape: f32[2,8,128], index: 3, kind: output, shape index: {1}]   ;;  %s1266_s4 = inlined_call_operand.hbm [shape: f32[2,8,128], index: 4, kind: output, shape index: {2}]  }
   0x1   :  { %1276 = sst [smem:[#allocation17_spill]] %s1262_s0 }
   0x2   :  { %1277 = sst [smem:[#allocation18_spill]] %s1263_s1 }
   0x3   :  { %10 = vsyncpa [#allocation3], 0 }
   0x4   :  { %12 = vsyncpa [#allocation3 + $0x1], 0 }
   0x5   :  { %13 = vsyncpa [#allocation6], 0 }
   0x6   :  { %15 = vsyncpa [#allocation6 + $0x1], 0 }
   0x7   :  { %16 = vsyncpa [#allocation4], 0 }
   0x8   :  { %18 = vsyncpa [#allocation4 + $0x1], 0 }
   0x9   :  { %19 = vsyncpa [#allocation9], 0 }
   0xa   :  { %21 = vsyncpa [#allocation9 + $0x1], 0  ;;  %s929_s15 = smov 0   ;;  %s931_s16 = smov 0  }
   0xb   :  { %s933_s17 = smov 0   ;;  %s935_s18 = smov 0  }
   0xc   :  { %s937_s19 = smov 0   ;;  %s939_s20 = smov 0  }
   0xd   :  { %s941_s21 = smov 0   ;;  %s943_s22 = smov 0  }
   0xe   :  { %s945_s23 = smov 0  }
   0xf LB: > { %1278 = sst [smem:[#allocation15_spill]] %s892_s22  ;;  %s973_s24 = sadd.s32 4294967295, %s896_s23   ;;  %s896_s23 = sphi %s945_s23, %s27_s23   ;;  %s892_s22 = sphi %s943_s22, %s1301_s22   ;;  %s888_s21 = sphi %s941_s21, %s1300_s21   ;;  %s884_s20 = sphi %s939_s20, %s1307_s20   ;;  %s880_s19 = sphi %s937_s19, %s1306_s19   ;;  %s876_s18 = sphi %s935_s18, %s1305_s18   ;;  %s872_s17 = sphi %s933_s17, %s1304_s17   ;;  %s868_s16 = sphi %s931_s16, %s1303_s16   ;;  %s864_s15 = sphi %s929_s15, %s1302_s15  }
  0x10   : > { %s1267_s25 = sadd.s32 4294967294, %s896_s23   ;;  %s39_s26 = sadd.s32 1, %s892_s22 }
  0x11   : > { %p44_p0 = scmp.lt.s32.totalorder %s892_s22, 1  ;;  %p41_p1 = scmp.ge.s32.totalorder %s39_s26, 2 }
  0x12   : > { %s52_s27 = sadd.s32 1, %s884_s20  ;;  %p59_p2 = scmp.ne.s32.totalorder %s884_s20, %s880_s19 }
  0x13   : > { %s980_s28 = scalar_select %p44_p0, %s892_s22, 1 }
  0x14   : > { %s1309_s26 = smov (%p41_p1, %s39_s26), 0  ;;  %p60_p3 = scmp.eq.s32.totalorder %s896_s23, 0 }
  0x15   : > { %1279 = sst [smem:[#allocation16_spill]] %s1309_s26  ;;  %p47_p4 = scmp.lt.s32.totalorder %s1309_s26, 1 }
  0x16   : > { %p65_p5 = scmp.ne.s32.totalorder %s880_s19, %s876_s18  ;;  %p989_p6 = por %p60_p3, %p59_p2 }
  0x17   : > { %p66_p7 = scmp.eq.s32.totalorder %s973_s24, 0  ;;  %s107_s6 = ssub.s32 %s892_s22, %s1309_s26 }
  0x18   : > { %s48_s30 = scalar_select %p47_p4, %s1309_s26, 1 }
  0x19   : > { %p995_p8 = por %p66_p7, %p65_p5  ;;  %p108_p9 = scmp.eq.s32.totalorder %s107_s6, 0 }
  0x1a   : > { %s49_s7 = ssub.s32 %s980_s28, %s48_s30  ;;  %s110_s8 = sadd.s32 1, %s872_s17 }
  0x1b   : > { %s1281_s5 = scalar_select %p995_p8, 1, 0 }
  0x1c   : > { %p50_p10 = scmp.eq.s32.totalorder %s49_s7, 0  ;;  %p120_p11 = scmp.ne.s32.totalorder %s872_s17, %s868_s16 }
  0x1d   : > { %s1004_s9 = scalar_select %p108_p9, %s872_s17, %s110_s8  }
  0x1e   : > { %s1007_s10 = scalar_select %p50_p10, %s884_s20, %s52_s27  }
  0x1f   : > { %p121_p12 = scmp.eq.s32.totalorder %s973_s24, 1  ;;  %p126_p13 = scmp.ne.s32.totalorder %s868_s16, %s864_s15 }
  0x20   : > { %p127_p0 = scmp.eq.s32.totalorder %s1267_s25, 1  ;;  %p591_p4 = scmp.lt.s32.totalorder %s896_s23, 2 }
  0x21   : > { %p1016_p1 = por %p121_p12, %p120_p11  ;;  %s1027_s13 = sand.u32 1, %s884_s20  }
  0x22   : > { %p1021_p3 = por %p127_p0, %p126_p13  ;;  %s1269_s14 = sshll.u32 %s980_s28, 7 }
  0x23   : > { %s1282_s11 = scalar_select %p1016_p1, 1, 0 }
  0x24   : > { %s1283_s12 = scalar_select %p1021_p3, 1, 0 }
  0x25   : > { %s1268_s18 = sshll.u32 %s1027_s13, 3  ;;  %s1284_s0 = sld [smem:[#allocation17_spill]] }
  0x26   : > { %s203_s7 = scalar_lea.vmem [#allocation2], %s1268_s18  ;;  %p1042_p5 = pnand %p591_p4, %p989_p6 }
  0x27   : > { %s213_s8 = sshll.u32 %s203_s7, 4  ;;  %s200_s27 = scalar_lea.sflag [#allocation3], %s1027_s13  ;;  %s1046_s8 = int_to_ptr.vmem [resolvable:$true] %s213_s8 }
  0x28   : > { %p668_p11 = pneg %p1042_p5 }
  0x2b   : > { %s1036_s6 = scalar_lea.hbm %s1284_s0, %s1269_s14  ;;  %s671_s18 = scalar_lea.hbm %s1284_s0, 256 }
  0x2c   : > { %s666_s30 = scalar_lea.hbm %s1036_s6, 128  ;;  %p672_p6 = scmp.lt.u32.totalorder %s1036_s6, %s1284_s0 }
  0x2d   : > { %p667_p10 = scmp.ne.s32.totalorder %s1036_s6, %s666_s30  ;;  %p673_p0 = scmp.lt.u32.totalorder %s671_s18, %s666_s30 }
  0x2e   : > { %p675_p2 = scmp.lt.u32.totalorder %s666_s30, %s1036_s6 }
  0x2f   : > { %p669_p12 = pnand %p668_p11, %p667_p10  ;;  %p674_p4 = por %p673_p0, %p672_p6 }
  0x31   : > { %p670_p13 = pneg %p669_p12  ;;  %p676_p7 = por %p675_p2, %p674_p4 }
  0x33   : > { %p677_p9 = pnand %p676_p7, %p670_p13 }
  0x35   : > { %680 = shalt.err (!%p677_p9)
}
  0x36   : > { %s681_s22 = scalar_lea.vmem %s1046_s8, 128  ;;  %s898_s29 = smov [#allocation2]  }
  0x37   : > { %p682_p10 = scmp.ne.s32.totalorder %s1046_s8, %s681_s22  ;;  %s686_s7 = sshll.u32 %s898_s29, 4  ;;  %s687_s7 = int_to_ptr.vmem [resolvable:$false] %s686_s7 }
  0x38   : > { %s688_s26 = scalar_lea.vmem %s687_s7, 256  ;;  %p689_p1 = scmp.lt.s32.totalorder %s1046_s8, %s687_s7 }
  0x39   : > { %p684_p12 = pnand %p682_p10, %p668_p11  ;;  %p690_p6 = scmp.lt.s32.totalorder %s688_s26, %s681_s22 }
  0x3b   : > { %p685_p3 = pneg %p684_p12  ;;  %p691_p0 = por %p690_p6, %p689_p1 }
  0x3d   : > { %p692_p2 = pnand %p691_p0, %p685_p3 }
  0x3f   : > { %695 = shalt.err (!%p692_p2)
}
  0x40   : > { %577 = dma.hbm_to_vmem [thread:$0]  (!%p1042_p5), %s1036_s6, 128, %s1046_s8, %s200_s27  }
  0x41   : > { %p1286_p7 = scmp.lt.s32.totalorder %s896_s23, 3  ;;  %p1287_p9 = scmp.ge.s32.totalorder %s896_s23, 1 }
  0x42   : > { %s1289_s22 = sshll.u32 %s980_s28, 7  ;;  %s1290_s1 = sld [smem:[#allocation18_spill]] }
  0x43   : > { %p1080_p13 = pnand %p1287_p9, %p1286_p7  ;;  %s1291_s7 = sshll.u32 %s1027_s13, 3 }
  0x44   : > { %s224_s26 = scalar_lea.vmem [#allocation5], %s1291_s7  ;;  %s221_s6 = scalar_lea.sflag [#allocation6], %s1027_s13 }
  0x45   : > { %s1288_s14 = scalar_select %p1080_p13, 1, 0 }
  0x46   : > { %s234_s0 = sshll.u32 %s224_s26, 4  ;;  %s235_s0 = int_to_ptr.vmem [resolvable:$true] %s234_s0 }
  0x48   : > { %s1089_s29 = scalar_lea.hbm %s1290_s1, %s1289_s22  ;;  %s701_s22 = scalar_lea.hbm %s1290_s1, 256 }
  0x49   : > { %s696_s8 = scalar_lea.hbm %s1089_s29, 128  ;;  %p702_p10 = scmp.lt.u32.totalorder %s1089_s29, %s1290_s1 }
  0x4a   : > { %p697_p1 = scmp.ne.s32.totalorder %s1089_s29, %s696_s8  ;;  %p703_p12 = scmp.lt.u32.totalorder %s701_s22, %s696_s8 }
  0x4b   : > { %p705_p0 = scmp.lt.u32.totalorder %s696_s8, %s1089_s29 }
  0x4c   : > { %p699_p3 = pnand %p697_p1, %p668_p11  ;;  %p704_p6 = por %p703_p12, %p702_p10 }
  0x4e   : > { %p700_p4 = pneg %p699_p3  ;;  %p706_p2 = por %p705_p0, %p704_p6 }
  0x50   : > { %p707_p7 = pnand %p706_p2, %p700_p4 }
  0x52   : > { %710 = shalt.err (!%p707_p7)
}
  0x53   : > { %s711_s13 = scalar_lea.vmem %s235_s0, 128  ;;  %s899_s7 = smov [#allocation5]  }
  0x54   : > { %p712_p9 = scmp.ne.s32.totalorder %s235_s0, %s711_s13  ;;  %s716_s26 = sshll.u32 %s899_s7, 4  ;;  %s717_s26 = int_to_ptr.vmem [resolvable:$false] %s716_s26 }
  0x55   : > { %s718_s28 = scalar_lea.vmem %s717_s26, 256  ;;  %p719_p8 = scmp.lt.s32.totalorder %s235_s0, %s717_s26 }
  0x56   : > { %p714_p1 = pnand %p712_p9, %p668_p11  ;;  %p720_p13 = scmp.lt.s32.totalorder %s718_s28, %s711_s13 }
  0x58   : > { %p715_p3 = pneg %p714_p1  ;;  %p721_p10 = por %p720_p13, %p719_p8 }
  0x5a   : > { %p722_p12 = pnand %p721_p10, %p715_p3 }
  0x5c   : > { %725 = shalt.err (!%p722_p12)
}
  0x5d   : > { %580 = dma.hbm_to_vmem [thread:$0]  (!%p1042_p5), %s1089_s29, 128, %s235_s0, %s221_s6  }
  0x5e   : > { %p1292_p4 = scmp.ne.s32.totalorder %s1288_s14, 0 }
  0x5f   : > { %s245_s8 = sand.u32 (!%p1292_p4), 1, %s880_s19   ;;  %p1293_p11 = scmp.ne.s32.totalorder (!%p1292_p4), %s1281_s5, 0 }
  0x60   : > { %243 = sbr.rel (%p1292_p4) target bundleno = 182 (0xb6), region = 28  ;;  %s551_s27 = sshll.u32 (!%p1292_p4), %s245_s8, 3 }
  0x61   : > { %s246_s22 = scalar_lea.sflag (!%p1292_p4), [#allocation3], %s245_s8  ;;  %s249_s18 = scalar_lea.vmem (!%p1292_p4), [#allocation2], %s551_s27 }
  0x67   : > { %847 = dma.done.wait (%p1293_p11), %s246_s22, 128  }
  0x68   : > { %849 = vsyncadd (%p1293_p11), %s246_s22, 4294967168  ;;  %s255_s30 = scalar_lea.sflag [#allocation6], %s245_s8  ;;  %s258_s13 = scalar_lea.vmem [#allocation5], %s551_s27 }
  0x69   : > { %851 = dma.done.wait (%p1293_p11), %s255_s30, 128  }
  0x6a   : > { %853 = vsyncadd (%p1293_p11), %s255_s30, 4294967168  ;;  %s1274_s0 = sand.u32 1, %s868_s16   ;;  %s335_s14 = sand.u32 1, %s973_s24   ;;  %v313_v0 = vld [vmem:[%s258_s13] sm:$0xff]  ;;  %v311_v1 = vld [vmem:[%s249_s18] sm:$0xff]  ;;  %v900_v2 = vmov 0.0  }
  0x6b   : > { %s1127_s25 = sshll.u32 %s1274_s0, 3  ;;  %s559_s29 = sshll.u32 %s888_s21, 7  ;;  %vm314_vm0 = vcmp.gt.f32.partialorder %v313_v0, 0.5  ;;  %vm312_vm1 = vcmp.gt.f32.partialorder %v311_v1, 0.0 }
  0x6c   : > { %s290_s6 = scalar_lea.vmem [#allocation8], %s1127_s25  ;;  %s283_s5 = scalar_lea.vmem [#allocation7], %s1127_s25  ;;  %v316_v3 = vsel %vm314_vm0, 1.0, %v900_v2  ;;  %v315_v4 = vsel %vm312_vm1, 1.0, %v900_v2 }
  0x6d   : > { %s367_s7 = sshll.u32 %s290_s6, 4  ;;  %s354_s26 = sshll.u32 %s283_s5, 4  ;;  %v326_v5 = vmul.f32 %v316_v3, %v315_v4  ;;  %324 = vst [vmem:[%s290_s6] sm:$0xff] %v316_v3  ;;  %320 = vst [vmem:[%s283_s5] sm:$0xff] %v315_v4  ;;  %s1141_s7 = int_to_ptr.vmem [resolvable:$true] %s367_s7  ;;  %s1148_s26 = int_to_ptr.vmem [resolvable:$true] %s354_s26 }
  0x6e   : > { %s1275_s28 = scalar_lea.vmem [#allocation10], %s1127_s25  ;;  %s1139_s24 = scalar_lea.hbm %s1265_s3, %s559_s29 }
  0x6f   : > { %s380_s8 = sshll.u32 %s1275_s28, 4  ;;  %s1146_s30 = scalar_lea.hbm %s1264_s2, %s559_s29  ;;  %s1150_s8 = int_to_ptr.vmem [resolvable:$true] %s380_s8 }
  0x70   : > { %s1155_s22 = scalar_lea.hbm %s1266_s4, %s559_s29  ;;  %s1157_s0 = scalar_lea.sflag [#allocation9], %s335_s14 }
  0x71   : > { %s726_s28 = scalar_lea.vmem %s1141_s7, 128  ;;  %p1294_p5 = scmp.ne.s32.totalorder %s1282_s11, 0 }
  0x72   : > { %p727_p8 = scmp.ne.s32.totalorder %s1141_s7, %s726_s28  ;;  %s901_s21 = smov [#allocation8]  }
  0x73   : > { %s730_s18 = sshll.u32 %s901_s21, 4  ;;  %s731_s18 = int_to_ptr.vmem [resolvable:$false] %s730_s18 }
  0x74   : > { %p728_p13 = pnand %p727_p8, %p1294_p5  ;;  %s732_s1 = scalar_lea.vmem %s731_s18, 256 }
  0x75   : > { %p733_p0 = scmp.lt.s32.totalorder %s1141_s7, %s731_s18  ;;  %p734_p2 = scmp.lt.s32.totalorder %s732_s1, %s726_s28 }
  0x76   : > { %p729_p6 = pneg %p728_p13 }
  0x77   : > { %p735_p7 = por %p734_p2, %p733_p0 }
  0x79   : > { %p736_p9 = pnand %p735_p7, %p729_p6 }
  0x7b   : > { %739 = shalt.err (!%p736_p9)
}
  0x7c   : > { %s740_s14 = scalar_lea.hbm %s1139_s24, 128  ;;  %s744_s5 = scalar_lea.hbm %s1265_s3, 256 }
  0x7d   : > { %p741_p1 = scmp.ne.s32.totalorder %s1139_s24, %s740_s14  ;;  %p745_p12 = scmp.lt.u32.totalorder %s1139_s24, %s1265_s3 }
  0x7e   : > { %p746_p4 = scmp.lt.u32.totalorder %s744_s5, %s740_s14  ;;  %p748_p8 = scmp.lt.u32.totalorder %s740_s14, %s1139_s24 }
  0x7f   : > { %p742_p3 = pnand %p741_p1, %p1294_p5 }
  0x80   : > { %p747_p11 = por %p746_p4, %p745_p12 }
  0x81   : > { %p743_p10 = pneg %p742_p3 }
  0x82   : > { %p749_p13 = por %p748_p8, %p747_p11 }
  0x84   : > { %p750_p6 = pnand %p749_p13, %p743_p10 }
  0x86   : > { %753 = shalt.err (!%p750_p6)
}
  0x87   : > { %569 = dma.vmem_to_hbm [thread:$0]  (%p1294_p5), %s1141_s7, 128, %s1139_s24, %s1157_s0  }
  0x88   : > { %s1295_s1 = scalar_lea.vmem [#allocation10], %s1127_s25  ;;  %s1296_s28 = sand.u32 1, %s868_s16  }
  0x89   : > { %329 = vst [vmem:[%s1295_s1] sm:$0xff] %v326_v5  ;;  %s331_s21 = scalar_lea.sflag [#allocation4], %s1296_s28  ;;  %s754_s18 = scalar_lea.vmem %s1148_s26, 128 }
  0x8a   : > { %p755_p0 = scmp.ne.s32.totalorder %s1148_s26, %s754_s18  ;;  %s902_s14 = smov [#allocation7]  }
  0x8b   : > { %s758_s29 = sshll.u32 %s902_s14, 4  ;;  %s759_s29 = int_to_ptr.vmem [resolvable:$false] %s758_s29 }
  0x8c   : > { %p756_p2 = pnand %p755_p0, %p1294_p5  ;;  %s760_s6 = scalar_lea.vmem %s759_s29, 256 }
  0x8d   : > { %p761_p9 = scmp.lt.s32.totalorder %s1148_s26, %s759_s29  ;;  %p762_p1 = scmp.lt.s32.totalorder %s760_s6, %s754_s18 }
  0x8e   : > { %p757_p7 = pneg %p756_p2 }
  0x8f   : > { %p763_p3 = por %p762_p1, %p761_p9 }
  0x91   : > { %p764_p10 = pnand %p763_p3, %p757_p7 }
  0x93   : > { %767 = shalt.err (!%p764_p10)
}
  0x94   : > { %s768_s25 = scalar_lea.hbm %s1146_s30, 128  ;;  %s772_s5 = scalar_lea.hbm %s1264_s2, 256 }
  0x95   : > { %p769_p12 = scmp.ne.s32.totalorder %s1146_s30, %s768_s25  ;;  %p773_p8 = scmp.lt.u32.totalorder %s1146_s30, %s1264_s2 }
  0x96   : > { %p774_p13 = scmp.lt.u32.totalorder %s772_s5, %s768_s25  ;;  %p776_p0 = scmp.lt.u32.totalorder %s768_s25, %s1146_s30 }
  0x97   : > { %p770_p4 = pnand %p769_p12, %p1294_p5 }
  0x98   : > { %p775_p6 = por %p774_p13, %p773_p8 }
  0x99   : > { %p771_p11 = pneg %p770_p4 }
  0x9a   : > { %p777_p2 = por %p776_p0, %p775_p6 }
  0x9c   : > { %p778_p7 = pnand %p777_p2, %p771_p11 }
  0x9e   : > { %781 = shalt.err (!%p778_p7)
}
  0x9f   : > { %568 = dma.vmem_to_hbm [thread:$0]  (%p1294_p5), %s1148_s26, 128, %s1146_s30, %s331_s21  }
  0xa0   : > { %s782_s1 = scalar_lea.vmem %s1150_s8, 128  ;;  %s903_s28 = smov [#allocation10]  }
  0xa1   : > { %p783_p9 = scmp.ne.s32.totalorder %s1150_s8, %s782_s1  ;;  %s786_s18 = sshll.u32 %s903_s28, 4  ;;  %s787_s18 = int_to_ptr.vmem [resolvable:$false] %s786_s18 }
  0xa2   : > { %s788_s14 = scalar_lea.vmem %s787_s18, 256  ;;  %p789_p10 = scmp.lt.s32.totalorder %s1150_s8, %s787_s18 }
  0xa3   : > { %p784_p1 = pnand %p783_p9, %p1294_p5  ;;  %p790_p12 = scmp.lt.s32.totalorder %s788_s14, %s782_s1 }
  0xa5   : > { %p785_p3 = pneg %p784_p1  ;;  %p791_p4 = por %p790_p12, %p789_p10 }
  0xa7   : > { %p792_p11 = pnand %p791_p4, %p785_p3 }
  0xa9   : > { %795 = shalt.err (!%p792_p11)
}
  0xaa   : > { %s796_s26 = scalar_lea.hbm %s1155_s22, 128  ;;  %s800_s29 = scalar_lea.hbm %s1266_s4, 256 }
  0xab   : > { %p797_p8 = scmp.ne.s32.totalorder %s1155_s22, %s796_s26  ;;  %p801_p0 = scmp.lt.u32.totalorder %s1155_s22, %s1266_s4 }
  0xac   : > { %p802_p2 = scmp.lt.u32.totalorder %s800_s29, %s796_s26  ;;  %p804_p9 = scmp.lt.u32.totalorder %s796_s26, %s1155_s22 }
  0xad   : > { %p798_p13 = pnand %p797_p8, %p1294_p5 }
  0xae   : > { %p803_p7 = por %p802_p2, %p801_p0 }
  0xaf   : > { %p799_p6 = pneg %p798_p13 }
  0xb0   : > { %p805_p1 = por %p804_p9, %p803_p7 }
  0xb2   : > { %p806_p3 = pnand %p805_p1, %p799_p6 }
  0xb4   : > { %809 = shalt.err (!%p806_p3)
}
  0xb5   : > { %570 = dma.vmem_to_hbm [thread:$0]  (%p1294_p5), %s1150_s8, 128, %s1155_s22, %s1157_s0  }
  0xb6 PF: > { %s392_s7 = sand.u32 1, %s864_s15   ;;  %p1297_p10 = scmp.ne.s32.totalorder %s1283_s12, 0 }
  0xb7   : > { %p1298_p12 = scmp.ge.s32.totalorder %s896_s23, 2  ;;  %s393_s24 = scalar_lea.sflag [#allocation4], %s392_s7 }
  0xb9   : > { %p582_p4 = pnand %p1298_p12, %p1297_p10 }
  0xbb   : > { %855 = dma.done.wait (!%p582_p4), %s393_s24, 128  }
  0xbc   : > { %857 = vsyncadd (!%p582_p4), %s393_s24, 4294967168  ;;  %s1299_s5 = sadd.s32 4294967294, %s896_s23  }
  0xbd   : > { %s401_s13 = sand.u32 1, %s1299_s5  }
  0xbe   : > { %s402_s27 = scalar_lea.sflag [#allocation9], %s401_s13 }
  0xbf   : > { %859 = dma.done.wait (!%p582_p4), %s402_s27, 256  }
  0xc0   : > { %861 = vsyncadd (!%p582_p4), %s402_s27, 4294967040  ;;  %s27_s23 = sadd.s32 1, %s896_s23   ;;  %s1300_s21 = sld [smem:[#allocation15_spill]] }
  0xc1   : > { %p24_p5 = scmp.ge.s32.totalorder %s27_s23, 4   ;;  %s1301_s22 = sld [smem:[#allocation16_spill]] }
  0xc2   : > { %s1302_s15 = smov %s868_s16  ;;  %s1303_s16 = smov %s872_s17 }
  0xc3   : > { %s1304_s17 = smov %s1004_s9  ;;  %s1305_s18 = smov %s880_s19 }
  0xc4   : > { %s1306_s19 = smov %s884_s20  ;;  %s1307_s20 = smov %s1007_s10 }
  0xc5   :  { %26 = sbr.rel (!%p24_p5) target bundleno = 15 (0xf), region = 122 }
  0xcc   :  { %416 = vsyncpa [#allocation3], 1 }
  0xcd   :  { %418 = vsyncpa [#allocation3 + $0x1], 1 }
  0xce   :  { %419 = vsyncpa [#allocation6], 1 }
  0xcf   :  { %421 = vsyncpa [#allocation6 + $0x1], 1 }
  0xd0   :  { %422 = vsyncpa [#allocation4], 1 }
  0xd1   :  { %424 = vsyncpa [#allocation4 + $0x1], 1 }
  0xd2   :  { %425 = vsyncpa [#allocation9], 1 }
  0xd3   :  { %427 = vsyncpa [#allocation9 + $0x1], 1 }

</bundles_post_ra>
